<compile_context>
chip_gen: v7x
topology: tpu7x:2x2x1
jax: 0.10.0
libtpu: 0.0.40
codegen_flags: <defaults>
</compile_context>

<pallas_src>
import jax
import jax.numpy as jnp
from jax.experimental import pallas as pl
from jax.experimental.pallas import tpu as pltpu


def _vmem_plan():
    """Return (vmem_limit_bytes, tile_budget_bytes), generation-aware."""
    cap = None
    try:
        info = pltpu.get_tpu_info()
        cap = int(getattr(info, "vmem_capacity_bytes", 0)) or None
    except Exception:
        cap = None
    if cap is None:
        cap = 64 * 1024 * 1024  # conservative fallback: v7x per-TensorCore VMEM
    # Leave headroom for Mosaic internal scratch / semaphores; 100 MiB ceiling
    # on 128 MiB parts (v5e/v6e), capacity-16 MiB on 64 MiB parts (v7x).
    limit = max(16 * 1024 * 1024, min(cap - 16 * 1024 * 1024, 100 * 1024 * 1024))
    budget = (3 * limit) // 4
    return limit, budget


def _pick_tb(batch, n, in_dim, out_dim, budget_bytes, itemsize=4):
    """Largest batch tile TB that divides B, keeps >=2 grid steps when the batch
    allows (so the 'parallel' axis can shard across v7x's two TensorCores), and
    whose double-buffered tiles PLUS in-kernel intermediates fit the budget."""
    w_bytes = 2 * in_dim * out_dim * itemsize  # resident weight, double-buffered

    def fits(tb):
        tiles = 2 * tb * n * (in_dim + n + out_dim) * itemsize   # x/adj/out, 2-buffered
        interm = 4 * tb * n * max(in_dim, out_dim) * itemsize    # xw/axw/relu/norm temps
        return tiles + interm + w_bytes <= budget_bytes

    best = 1
    cap = max(1, batch // 2)  # keep >= 2 grid steps when possible
    for tb in range(1, cap + 1):
        if batch % tb == 0 and fits(tb):
            best = tb
    return best


def gcn_kernel(x_ref, adj_ref, w_ref, o_ref):
    # x_ref:   (TB, N, I)   f32 VMEM tile (TB batch elements)
    # adj_ref: (TB, N, N)   f32
    # w_ref:   (I, O)       f32 shared weight (same block every grid step)
    # o_ref:   (TB, N, O)
    tb, n, in_dim = x_ref.shape
    out_dim = w_ref.shape[1]

    x = x_ref[...]
    adj = adj_ref[...]
    w = w_ref[...]

    if out_dim <= in_dim:
        # One big fused (TB*N, I) @ (I, O) MXU call, then batched adj @ xw
        # (the N x N adjacency contraction runs on the narrower width O).
        xw = jnp.dot(x.reshape(tb * n, in_dim), w,
                     preferred_element_type=jnp.float32).reshape(tb, n, out_dim)
        axw = jnp.einsum("bnm,bmo->bno", adj, xw,
                         preferred_element_type=jnp.float32)
    else:
        # adj @ x first (narrower width I), then one big fused (.) @ w.
        ax = jnp.einsum("bnm,bmi->bni", adj, x,
                        preferred_element_type=jnp.float32)
        axw = jnp.dot(ax.reshape(tb * n, in_dim), w,
                      preferred_element_type=jnp.float32).reshape(tb, n, out_dim)

    # Epilogue on the VPU/EUP (f32).
    y_relu = jnp.maximum(axw, 0.0)
    col_mean = jnp.mean(y_relu, axis=1, keepdims=True) + 1e-6   # node (sublane) mean
    y_norm = y_relu * pl.reciprocal(col_mean, approx=True)      # EUP reciprocal
    o_ref[...] = jnp.logaddexp(y_norm, 0.0).astype(o_ref.dtype)  # softplus


def gcn_forward(x, adj, kernel):
    B, N, in_dim = x.shape
    out_dim = kernel.shape[1]

    vmem_limit, tile_budget = _vmem_plan()
    tb = _pick_tb(B, N, in_dim, out_dim, tile_budget)
    grid = (B // tb,)

    # Block shapes equal the full array dims on the last two axes (no padding,
    # no masked DMAs, no extra pad/slice HBM passes for narrow feature widths).
    return pl.pallas_call(
        gcn_kernel,
        out_shape=jax.ShapeDtypeStruct((B, N, out_dim), x.dtype),
        grid_spec=pltpu.PrefetchScalarGridSpec(
            num_scalar_prefetch=0,
            grid=grid,
            in_specs=[
                pl.BlockSpec((tb, N, in_dim), lambda b: (b, 0, 0)),
                pl.BlockSpec((tb, N, N), lambda b: (b, 0, 0)),
                pl.BlockSpec((in_dim, out_dim), lambda b: (0, 0)),
            ],
            out_specs=pl.BlockSpec((tb, N, out_dim), lambda b: (b, 0, 0)),
        ),
        compiler_params=pltpu.CompilerParams(
            dimension_semantics=("parallel",),
            vmem_limit_bytes=vmem_limit,
        ),
    )(x, adj, kernel)


def gcn_reference(x, adj, kernel):
    hp = jax.lax.Precision.HIGHEST
    xw = jnp.einsum("bni,io->bno", x, kernel, precision=hp)
    axw = jnp.einsum("bnm,bmo->bno", adj, xw, precision=hp)
    y_relu = jnp.maximum(axw, 0.0)
    col_mean = jnp.mean(y_relu, axis=-2, keepdims=True) + 1e-6
    y_norm = y_relu / col_mean
    return jnp.logaddexp(y_norm, 0.0)


if __name__ == "__main__":
    # Small shapes consistent with GCN(in_dim, out_dim) applied to
    # x: (B, N, in_dim), adj: (B, N, N).  B=8 so batch tiling (TB=4, grid=2)
    # and megacore sharding of the batch axis are exercised.
    B, N, in_dim, out_dim = 8, 16, 32, 32

    key = jax.random.PRNGKey(0)
    kx, ka, kw = jax.random.split(key, 3)

    x = jax.random.normal(kx, (B, N, in_dim), dtype=jnp.float32)
    adj = jax.random.uniform(ka, (B, N, N), dtype=jnp.float32)

    # Deterministic xavier-normal init of the GCN kernel parameter.
    xavier_std = (2.0 / (in_dim + out_dim)) ** 0.5
    kernel = xavier_std * jax.random.normal(kw, (in_dim, out_dim), dtype=jnp.float32)

    out = jax.block_until_ready(gcn_forward(x, adj, kernel))
    ref = gcn_reference(x, adj, kernel)

    assert out.shape == (B, N, out_dim)
    # f32 matmuls everywhere; residual error is the approx-reciprocal (~2^-12
    # relative on the mean normalization) plus matmul ordering differences.
    err = float(jnp.max(jnp.abs(out - ref)))
    assert jnp.allclose(out, ref, atol=2e-2, rtol=2e-2), err

    print("KERNEL_OK")
</pallas_src>

<mosaic_0001>
module attributes {stable_mosaic.version = 11 : i64} {
  func.func @gcn_kernel(%arg0: i32, %arg1: memref<4x16x32xf32, #tpu.memory_space<vmem>>, %arg2: memref<4x16x16xf32, #tpu.memory_space<vmem>>, %arg3: memref<32x32xf32, #tpu.memory_space<vmem>>, %arg4: memref<4x16x32xf32, #tpu.memory_space<vmem>>) attributes {dimension_semantics = [#tpu.dimension_semantics<parallel>], iteration_bounds = array<i64: 2>, scalar_prefetch = 0 : i64, scratch_operands = 0 : i64, tpu.core_type = #tpu.core_type<tc>, window_params = [{transform_indices = @transform_0, window_bounds = array<i64: 4, 16, 32>}, {transform_indices = @transform_1, window_bounds = array<i64: 4, 16, 16>}, {pipeline_mode = #tpu.pipeline_mode<synchronous>, transform_indices = @transform_2, window_bounds = array<i64: 32, 32>}, {transform_indices = @transform_3, window_bounds = array<i64: 4, 16, 32>}]} {
    %c0 = arith.constant 0 : index
    %c0_0 = arith.constant 0 : index
    %c0_1 = arith.constant 0 : index
    %0 = vector.load %arg1[%c0, %c0_0, %c0_1] : memref<4x16x32xf32, #tpu.memory_space<vmem>>, vector<4x16x32xf32>
    %c0_2 = arith.constant 0 : index
    %c0_3 = arith.constant 0 : index
    %c0_4 = arith.constant 0 : index
    %1 = vector.load %arg2[%c0_2, %c0_3, %c0_4] : memref<4x16x16xf32, #tpu.memory_space<vmem>>, vector<4x16x16xf32>
    %c0_5 = arith.constant 0 : index
    %c0_6 = arith.constant 0 : index
    %2 = vector.load %arg3[%c0_5, %c0_6] : memref<32x32xf32, #tpu.memory_space<vmem>>, vector<32x32xf32>
    %3 = vector.shape_cast %0 : vector<4x16x32xf32> to vector<64x32xf32>
    %cst = arith.constant dense<0.000000e+00> : vector<64x32xf32>
    %4 = tpu.matmul %3, %2, %cst {dimension_numbers = #tpu.dot_dimension_numbers<[1], [0], [0], [1], [0, 0, 1, 1], [], []>} : vector<64x32xf32>, vector<32x32xf32>, vector<64x32xf32> -> vector<64x32xf32>
    %5 = vector.shape_cast %4 : vector<64x32xf32> to vector<4x16x32xf32>
    "tpu.trace_start"() <{level = 10 : i32, message = "bnm,bmo->bno"}> : () -> ()
    %cst_7 = arith.constant dense<0.000000e+00> : vector<4x16x32xf32>
    %6 = tpu.matmul %1, %5, %cst_7 {dimension_numbers = #tpu.dot_dimension_numbers<[2], [1], [1], [2], [0, 0, 0, 1, 1, 2], [0], [0]>} : vector<4x16x16xf32>, vector<4x16x32xf32>, vector<4x16x32xf32> -> vector<4x16x32xf32>
    "tpu.trace_stop"() : () -> ()
    %cst_8 = arith.constant 0.000000e+00 : f32
    %7 = vector.broadcast %cst_8 : f32 to vector<4x16x32xf32>
    %8 = arith.maximumf %6, %7 : vector<4x16x32xf32>
    %cst_9 = arith.constant dense<0.000000e+00> : vector<4x32xf32>
    %9 = vector.multi_reduction <add>, %8, %cst_9 [1] : vector<4x16x32xf32> to vector<4x32xf32>
    %10 = vector.shape_cast %9 : vector<4x32xf32> to vector<4x1x32xf32>
    %cst_10 = arith.constant 1.600000e+01 : f32
    %11 = vector.broadcast %cst_10 : f32 to vector<4x1x32xf32>
    %12 = arith.divf %10, %11 : vector<4x1x32xf32>
    %cst_11 = arith.constant 9.99999997E-7 : f32
    %13 = vector.broadcast %cst_11 : f32 to vector<4x1x32xf32>
    %14 = arith.addf %12, %13 : vector<4x1x32xf32>
    %15 = tpu.reciprocal %14 {approx = true} : vector<4x1x32xf32> -> vector<4x1x32xf32>
    %16 = vector.broadcast %15 : vector<4x1x32xf32> to vector<4x16x32xf32>
    %17 = arith.mulf %8, %16 : vector<4x16x32xf32>
    %cst_12 = arith.constant 0.000000e+00 : f32
    %18 = vector.broadcast %cst_12 : f32 to vector<4x16x32xf32>
    %19 = arith.maximumf %17, %18 : vector<4x16x32xf32>
    %20 = vector.broadcast %cst_12 : f32 to vector<4x16x32xf32>
    %21 = arith.subf %17, %20 : vector<4x16x32xf32>
    %22 = arith.cmpf one, %21, %21 : vector<4x16x32xf32>
    %23 = vector.broadcast %cst_12 : f32 to vector<4x16x32xf32>
    %24 = arith.addf %17, %23 : vector<4x16x32xf32>
    %25 = math.absf %21 : vector<4x16x32xf32>
    %cst_13 = arith.constant 0.000000e+00 : f32
    %26 = vector.broadcast %cst_13 : f32 to vector<4x16x32xf32>
    %27 = arith.subf %26, %25 : vector<4x16x32xf32>
    %28 = math.exp %27 : vector<4x16x32xf32>
    %29 = math.log1p %28 : vector<4x16x32xf32>
    %30 = arith.addf %19, %29 : vector<4x16x32xf32>
    %31 = arith.select %22, %24, %30 : vector<4x16x32xi1>, vector<4x16x32xf32>
    %c0_14 = arith.constant 0 : index
    %c0_15 = arith.constant 0 : index
    %c0_16 = arith.constant 0 : index
    %32 = vector.load %arg4[%c0_14, %c0_15, %c0_16] : memref<4x16x32xf32, #tpu.memory_space<vmem>>, vector<4x16x32xf32>
    tpu.vector_store %arg4[%c0_14, %c0_15, %c0_16], %31 {strides = array<i32>} : memref<4x16x32xf32, #tpu.memory_space<vmem>>, vector<4x16x32xf32>,
    return
  }
  func.func @transform_0(%arg0: i32) -> (i32, i32, i32) {
    %c0_i32 = arith.constant 0 : i32
    %c0_i32_0 = arith.constant 0 : i32
    %c0_i32_1 = arith.constant 0 : i32
    return %arg0, %c0_i32, %c0_i32_0 : i32, i32, i32
  }
  func.func @transform_1(%arg0: i32) -> (i32, i32, i32) {
    %c0_i32 = arith.constant 0 : i32
    %c0_i32_0 = arith.constant 0 : i32
    %c0_i32_1 = arith.constant 0 : i32
    return %arg0, %c0_i32, %c0_i32_0 : i32, i32, i32
  }
  func.func @transform_2(%arg0: i32) -> (i32, i32) {
    %c0_i32 = arith.constant 0 : i32
    %c0_i32_0 = arith.constant 0 : i32
    %c0_i32_1 = arith.constant 0 : i32
    return %c0_i32, %c0_i32_0 : i32, i32
  }
  func.func @transform_3(%arg0: i32) -> (i32, i32, i32) {
    %c0_i32 = arith.constant 0 : i32
    %c0_i32_0 = arith.constant 0 : i32
    %c0_i32_1 = arith.constant 0 : i32
    return %arg0, %c0_i32, %c0_i32_0 : i32, i32, i32
  }
}

</mosaic_0001>

<bundles_post_ra>
// kernel: tpu_custom_call.1
= control target key start
LH: loop header
LB: loop body
LE: loop exit
PB: predicated region body
PF: predicated region fallthrough
CT: control target
= control target key end

     0   :  { %s1967_s0 = inlined_call_operand.hbm [shape: f32[8,16,32], index: 0, kind: input, shape index: {}]   ;;  %s1968_s1 = inlined_call_operand.hbm [shape: f32[8,16,16], index: 1, kind: input, shape index: {}]   ;;  %s1969_s2 = inlined_call_operand.hbm [shape: f32[32,32], index: 2, kind: input, shape index: {}]   ;;  %s1970_s3 = inlined_call_operand.hbm [shape: f32[8,16,32], index: 3, kind: output, shape index: {}]  }
   0x1   :  { %1978 = sst [smem:[#allocation13_spill]] %s1967_s0 }
   0x2   :  { %1979 = sst [smem:[#allocation14_spill]] %s1969_s2 }
   0x3   :  { %8 = vsyncpa [#allocation3], 0 }
   0x4   :  { %10 = vsyncpa [#allocation3 + $0x1], 0 }
   0x5   :  { %11 = vsyncpa [#allocation6], 0 }
   0x6   :  { %13 = vsyncpa [#allocation6 + $0x1], 0 }
   0x7   :  { %14 = vsyncpa [#allocation4], 0 }
   0x8   :  { %16 = vsyncpa [#allocation4 + $0x1], 0  ;;  %s1503_s12 = smov 0   ;;  %s1505_s13 = smov 0  }
   0x9   :  { %s1507_s14 = smov 0   ;;  %s1509_s15 = smov 0  }
   0xa LB: > { %s1524_s16 = sadd.s32 4294967295, %s1473_s15   ;;  %s1060_s17 = sadd.s32 4294967294, %s1473_s15   ;;  %s1473_s15 = sphi %s1509_s15, %s2006_s15   ;;  %s1469_s14 = sphi %s1507_s14, %s2005_s14   ;;  %s1465_s13 = sphi %s1505_s13, %s2004_s13   ;;  %s1461_s12 = sphi %s1503_s12, %s2003_s12  }
   0xb   : > { %p42_p0 = scmp.ne.s32.totalorder %s1465_s13, %s1461_s12  ;;  %p1971_p1 = scmp.eq.s32.totalorder %s1524_s16, 0 }
   0xc   : > { %p119_p3 = scmp.eq.s32.totalorder %s1060_s17, 1  ;;  %p1061_p5 = scmp.ge.s32.totalorder %s1473_s15, 1 }
   0xd   : > { %p1533_p4 = por %p1971_p1, %p42_p0  ;;  %p126_p7 = scmp.lt.s32.totalorder %s1473_s15, 3 }
   0xe   : > { %p1538_p6 = por %p119_p3, %p42_p0  ;;  %s1475_s21 = smov [#allocation7]  }
   0xf   : > { %s1980_s18 = scalar_select %p1533_p4, 1, 0 }
  0x10   : > { %s1981_s19 = scalar_select %p1538_p6, 1, 0 }
  0x11   : > { %p1543_p8 = pnand %p1061_p5, %p126_p7  ;;  %s138_s22 = sshll.u32 %s1475_s21, 4  ;;  %s1547_s22 = int_to_ptr.vmem [resolvable:$true] %s138_s22 }
  0x12   : > { %s1559_s24 = sadd.s32 1, %s1473_s15   ;;  %s29_s25 = sadd.s32 1, %s1469_s14 }
  0x13   : > { %s1982_s20 = scalar_select %p1543_p8, 1, 0 }
  0x14   : > { %p1215_p9 = pneg %p1543_p8  ;;  %s26_s26 = ssub.s32 %s1473_s15, %s1559_s24 }
  0x15   : > { %s1984_s2 = sld [smem:[#allocation14_spill]] }
  0x16   : > { %p1554_p11 = pnand %p1215_p9, %p1971_p1 }
  0x18   : > { %p1313_p13 = pneg %p1554_p11 }
  0x1b   : > { %s1311_s29 = scalar_lea.hbm %s1984_s2, 512 }
  0x1c   : > { %p1312_p12 = scmp.ne.s32.totalorder %s1984_s2, %s1311_s29  ;;  %p1318_p5 = scmp.lt.u32.totalorder %s1311_s29, %s1984_s2 }
  0x1e   : > { %p1314_p0 = pnand %p1313_p13, %p1312_p12 }
  0x20   : > { %p1315_p3 = pneg %p1314_p0 }
  0x22   : > { %p1320_p7 = pnand %p1318_p5, %p1315_p3 }
  0x24   : > { %1323 = shalt.err (!%p1320_p7)
}
  0x25   : > { %s1324_s7 = scalar_lea.vmem %s1547_s22, 512  ;;  %p1332_p2 = scmp.lt.s32.totalorder %s1547_s22, %s1547_s22 }
  0x26   : > { %p1325_p9 = scmp.ne.s32.totalorder %s1547_s22, %s1324_s7  ;;  %p1333_p6 = scmp.lt.s32.totalorder %s1324_s7, %s1324_s7 }
  0x28   : > { %p1327_p10 = pnand %p1325_p9, %p1313_p13  ;;  %p1334_p4 = por %p1333_p6, %p1332_p2 }
  0x2a   : > { %p1328_p1 = pneg %p1327_p10 }
  0x2c   : > { %p1335_p8 = pnand %p1334_p4, %p1328_p1 }
  0x2e   : > { %1338 = shalt.err (!%p1335_p8)
}
  0x2f   : > { %s1974_s8 = smov 128   ;;  %s1976_s9 = smov 8  }
  0x30   : > { %1218 = dma.hbm_to_vmem [thread:$0]  (!%p1554_p11), %s1984_s2, 512, %s1547_s22, [#allocation6], %s1974_s8, %s1974_s8, %s1976_s9  }
  0x31   : > { %p27_p1 = scmp.eq.s32.totalorder %s26_s26, 0  ;;  %p36_p2 = scmp.ne.s32.totalorder %s1469_s14, %s1465_s13 }
  0x32   : > { %p37_p4 = scmp.eq.s32.totalorder %s1473_s15, 0  ;;  %p1231_p6 = scmp.lt.s32.totalorder %s1473_s15, 2 }
  0x33   : > { %s1593_s17 = scalar_select %p27_p1, %s1469_s14, %s29_s25  }
  0x34   : > { %p38_p8 = por %p37_p4, %p36_p2  ;;  %p1985_p10 = scmp.eq.s32.totalorder %s1524_s16, 1 }
  0x35   : > { %s152_s23 = sand.u32 1, %s1469_s14   ;;  %s1100_s27 = sshll.u32 %s1473_s15, 10 }
  0x36   : > { %p1597_p12 = por %p1985_p10, %p36_p2  ;;  %s1603_s28 = sshll.u32 %s152_s23, 6 }
  0x37   : > { %s1987_s0 = sld [smem:[#allocation13_spill]]  ;;  %s156_s25 = scalar_lea.vmem [#allocation2], %s1603_s28 }
  0x38   : > { %s164_s26 = sshll.u32 %s156_s25, 4  ;;  %p1611_p11 = pnand %p1231_p6, %p38_p8  ;;  %s1615_s26 = int_to_ptr.vmem [resolvable:$true] %s164_s26 }
  0x39   : > { %s1620_s7 = scalar_lea.hbm %s1968_s1, %s1100_s27  ;;  %s1622_s10 = scalar_lea.sflag [#allocation3], %s152_s23 }
  0x3a   : > { %p1341_p0 = pneg %p1611_p11 }
  0x3d   : > { %s1608_s22 = scalar_lea.hbm %s1987_s0, %s1100_s27  ;;  %s1344_s25 = scalar_lea.hbm %s1987_s0, 2048 }
  0x3e   : > { %s1339_s11 = scalar_lea.hbm %s1608_s22, 1024  ;;  %p1345_p7 = scmp.lt.u32.totalorder %s1608_s22, %s1987_s0 }
  0x3f   : > { %p1340_p13 = scmp.ne.s32.totalorder %s1608_s22, %s1339_s11  ;;  %p1346_p9 = scmp.lt.u32.totalorder %s1344_s25, %s1339_s11 }
  0x40   : > { %p1348_p2 = scmp.lt.u32.totalorder %s1339_s11, %s1608_s22 }
  0x41   : > { %p1342_p3 = pnand %p1341_p0, %p1340_p13  ;;  %p1347_p1 = por %p1346_p9, %p1345_p7 }
  0x43   : > { %p1343_p5 = pneg %p1342_p3  ;;  %p1349_p4 = por %p1348_p2, %p1347_p1 }
  0x45   : > { %p1350_p6 = pnand %p1349_p4, %p1343_p5 }
  0x47   : > { %1353 = shalt.err (!%p1350_p6)
}
  0x48   : > { %s1354_s23 = scalar_lea.vmem %s1615_s26, 1024  ;;  %s1478_s27 = smov [#allocation2]  }
  0x49   : > { %p1355_p8 = scmp.ne.s32.totalorder %s1615_s26, %s1354_s23  ;;  %s1359_s5 = sshll.u32 %s1478_s27, 4  ;;  %s1360_s5 = int_to_ptr.vmem [resolvable:$false] %s1359_s5 }
  0x4a   : > { %s1361_s8 = scalar_lea.vmem %s1360_s5, 2048  ;;  %p1362_p3 = scmp.lt.s32.totalorder %s1615_s26, %s1360_s5 }
  0x4b   : > { %p1357_p10 = pnand %p1355_p8, %p1341_p0  ;;  %p1363_p7 = scmp.lt.s32.totalorder %s1361_s8, %s1354_s23 }
  0x4d   : > { %p1358_p13 = pneg %p1357_p10  ;;  %p1364_p9 = por %p1363_p7, %p1362_p3 }
  0x4f   : > { %p1365_p1 = pnand %p1364_p9, %p1358_p13 }
  0x51   : > { %1368 = shalt.err (!%p1365_p1)
}
  0x52   : > { %s1989_s9 = smov 8   ;;  %s1990_s6 = smov 128  }
  0x53   : > { %1222 = dma.hbm_to_vmem [thread:$0]  (!%p1611_p11), %s1608_s22, 1024, %s1615_s26, %s1622_s10, %s1990_s6, %s1990_s6, %s1989_s9  }
  0x54   : > { %s178_s11 = scalar_lea.vmem [#allocation5], %s1603_s28  ;;  %s174_s30 = sand.u32 1, %s1473_s15  }
  0x55   : > { %s186_s29 = sshll.u32 %s178_s11, 4  ;;  %s1657_s25 = scalar_lea.sflag [#allocation6], %s174_s30  ;;  %s1655_s29 = int_to_ptr.vmem [resolvable:$true] %s186_s29 }
  0x56   : > { %s1369_s23 = scalar_lea.hbm %s1620_s7, 1024  ;;  %s1374_s8 = scalar_lea.hbm %s1968_s1, 2048 }
  0x57   : > { %p1370_p5 = scmp.ne.s32.totalorder %s1620_s7, %s1369_s23  ;;  %p1375_p6 = scmp.lt.u32.totalorder %s1620_s7, %s1968_s1 }
  0x58   : > { %p1376_p8 = scmp.lt.u32.totalorder %s1374_s8, %s1369_s23  ;;  %p1378_p13 = scmp.lt.u32.totalorder %s1369_s23, %s1620_s7 }
  0x59   : > { %p1372_p2 = pnand %p1370_p5, %p1341_p0 }
  0x5a   : > { %p1377_p10 = por %p1376_p8, %p1375_p6 }
  0x5b   : > { %p1373_p4 = pneg %p1372_p2 }
  0x5c   : > { %p1379_p3 = por %p1378_p13, %p1377_p10 }
  0x5e   : > { %p1380_p7 = pnand %p1379_p3, %p1373_p4 }
  0x60   : > { %1383 = shalt.err (!%p1380_p7)
}
  0x61   : > { %s1384_s28 = scalar_lea.vmem %s1655_s29, 1024  ;;  %s1479_s22 = smov [#allocation5]  }
  0x62   : > { %p1385_p9 = scmp.ne.s32.totalorder %s1655_s29, %s1384_s28  ;;  %s1389_s26 = sshll.u32 %s1479_s22, 4  ;;  %s1390_s26 = int_to_ptr.vmem [resolvable:$false] %s1389_s26 }
  0x63   : > { %s1391_s0 = scalar_lea.vmem %s1390_s26, 2048  ;;  %p1392_p2 = scmp.lt.s32.totalorder %s1655_s29, %s1390_s26 }
  0x64   : > { %p1387_p1 = pnand %p1385_p9, %p1341_p0  ;;  %p1393_p6 = scmp.lt.s32.totalorder %s1391_s0, %s1384_s28 }
  0x66   : > { %p1388_p5 = pneg %p1387_p1  ;;  %p1394_p8 = por %p1393_p6, %p1392_p2 }
  0x68   : > { %p1395_p10 = pnand %p1394_p8, %p1388_p5 }
  0x6a   : > { %1398 = shalt.err (!%p1395_p10)
}
  0x6b   : > { %1225 = dma.hbm_to_vmem [thread:$0]  (!%p1611_p11), %s1620_s7, 1024, %s1655_s29, %s1657_s25, %s1990_s6, %s1990_s6, %s1989_s9  }
  0x6c   : > { %p1991_p0 = scmp.ne.s32.totalorder %s1982_s20, 0 }
  0x6d   : > { %s1689_s2 = sand.u32 (!%p1991_p0), 1, %s1465_s13   ;;  %p1992_p4 = scmp.ne.s32.totalorder (!%p1991_p0), %s1980_s18, 0 }
  0x6e   : > { %198 = sbr.rel (%p1991_p0) target bundleno = 675 (0x2a3), region = 32  ;;  %s1692_s10 = sshll.u32 (!%p1991_p0), %s1689_s2, 6 }
  0x6f   : > { %s201_s4 = scalar_lea.sflag (!%p1991_p0), [#allocation3], %s1689_s2  ;;  %s1696_s11 = scalar_lea.vmem (!%p1991_p0), [#allocation2], %s1692_s10 }
  0x75   : > { %1444 = dma.done.wait (%p1992_p4), %s201_s4, 1024  }
  0x76   : > { %1446 = vsyncadd (%p1992_p4), %s201_s4, 4294966272  ;;  %s209_s20 = sand.u32 1, %s1524_s16   ;;  %s1704_s9 = scalar_lea.vmem [#allocation5], %s1692_s10 }
  0x77   : > { %s210_s7 = scalar_lea.sflag [#allocation6], %s209_s20 }
  0x78   : > { %1448 = dma.done.wait (%p1992_p4), %s210_s7, 1024  }
  0x79   : > { %1450 = vsyncadd (%p1992_p4), %s210_s7, 4294966272  ;;  %p1993_p11 = scmp.eq.s32.totalorder %s1524_s16, 0 }
  0x7b   : > { %1452 = dma.done.wait (%p1993_p11), [#allocation6], 512   ;;  %p1994_p13 = pmov %p1993_p11 }
  0x7c   : > { %vm268_vm0 = vcmask 261120   ;;  %v264_v0 = vld [vmem:[#allocation7] sm:$0xff]  ;;  %v265_v1 = vld [vmem:[#allocation7 + $0x8] sm:$0xff]  ;;  %v266_v2 = vld [vmem:[#allocation7 + $0x10] sm:$0xff]  ;;  %vm398_vm1 = vcmask 130048   ;;  %s1860_s18 = scalar_lea.vmem [#allocation8], %s1692_s10 }
  0x7d   : > { %1454 = vsyncadd (%p1994_p13), [#allocation6], 4294966784  ;;  %v1181_v3 = vpack.c.bf16 %v265_v1, %v264_v0  ;;  %v267_v4 = vld [vmem:[#allocation7 + $0x18] sm:$0xff]  ;;  %v248_v5 = vld [vmem:[%s1696_s11] sm:$0xff]  ;;  %s1104_s6 = sshll.u32 %s1524_s16, 10  ;;  %s955_s29 = sshll.u32 %s1860_s18, 4  ;;  %s1918_s29 = int_to_ptr.vmem [resolvable:$true] %s955_s29 }
  0x7e   : > { %v1185_v6 = vpack.c.bf16 %v267_v4, %v266_v2  ;;  %1141 = vmatprep.mubr.msk.f32.mxu0 %vm268_vm0, %v248_v5  ;;  %v249_v7 = vld [vmem:[%s1696_s11 + $0x8] sm:$0xff]  ;;  %v250_v8 = vld [vmem:[%s1696_s11 + $0x10] sm:$0xff]  ;;  %v251_v9 = vld [vmem:[%s1696_s11 + $0x18] sm:$0xff]  ;;  %s1916_s23 = scalar_lea.hbm %s1970_s3, %s1104_s6  ;;  %s941_s16 = scalar_lea.sflag [#allocation4], %s1689_s2 }
  0x7f   : > { %1182 = vmatprep.subr.bf16.mxu0 %v1181_v3  ;;  %v252_v10 = vld [vmem:[%s1696_s11 + $0x20] sm:$0xff]  ;;  %v253_v11 = vld [vmem:[%s1696_s11 + $0x28] sm:$0xff]  ;;  %v254_v12 = vld [vmem:[%s1696_s11 + $0x30] sm:$0xff]  ;;  %s1399_s27 = scalar_lea.vmem %s1918_s29, 1024  ;;  %s1480_s5 = smov [#allocation8]  }
  0x80   : > { %1184 = vmatpush3.bf16.msra.mxu0 %v1181_v3  ;;  %v255_v13 = vld [vmem:[%s1696_s11 + $0x38] sm:$0xff]  ;;  %v256_v14 = vld [vmem:[%s1704_s9] sm:$0xff]  ;;  %v257_v20 = vld [vmem:[%s1704_s9 + $0x8] sm:$0xff]  ;;  %p1400_p3 = scmp.ne.s32.totalorder %s1918_s29, %s1399_s27  ;;  %s1403_s8 = sshll.u32 %s1480_s5, 4  ;;  %s1404_s8 = int_to_ptr.vmem [resolvable:$false] %s1403_s8 }
  0x81   : > { %1186 = vmatprep.subr.bf16.mxu0 %v1185_v6  ;;  %1157 = vmatprep.mubr.msk.f32.mxu1 %vm398_vm1, %v256_v14  ;;  %v258_v22 = vld [vmem:[%s1704_s9 + $0x10] sm:$0xff]  ;;  %v259_v25 = vld [vmem:[%s1704_s9 + $0x18] sm:$0xff]  ;;  %v260_v27 = vld [vmem:[%s1704_s9 + $0x20] sm:$0xff]  ;;  %s1405_s28 = scalar_lea.vmem %s1404_s8, 2048  ;;  %p1406_p1 = scmp.lt.s32.totalorder %s1918_s29, %s1404_s8 }
  0x82   : > { %v261_v30 = vld [vmem:[%s1704_s9 + $0x28] sm:$0xff]  ;;  %v262_v32 = vld [vmem:[%s1704_s9 + $0x30] sm:$0xff]  ;;  %v263_v33 = vld [vmem:[%s1704_s9 + $0x38] sm:$0xff]  ;;  %p1401_p7 = pnand %p1400_p3, %p1597_p12  ;;  %p1407_p5 = scmp.lt.s32.totalorder %s1405_s28, %s1399_s27 }
  0x84   : > { %1188 = vmatpush3.bf16.msra.mxu0 %v1185_v6  ;;  %p1402_p9 = pneg %p1401_p7  ;;  %p1408_p2 = por %p1407_p5, %p1406_p1 }
  0x86   : > { %p1409_p6 = pnand %p1408_p2, %p1402_p9 }
  0x87   : > { %1142 = vmatmul.mubr.msk.f32.vlgmr.msra.gmra.mrb[0].mxu0 %vm268_vm0, %v249_v7 }
  0x88   : > { %1144 = vmatprep.mubr.msk.f32.mxu0 %vm268_vm0, %v250_v8 }
  0x8b   : > { %1145 = vmatmul.mubr.msk.f32.gmra.mrb[2].mxu0 %vm268_vm0, %v251_v9 }
  0x8c   : > { %1147 = vmatprep.mubr.msk.f32.mxu0 %vm268_vm0, %v252_v10 }
  0x8f   : > { %1148 = vmatmul.mubr.msk.f32.gmra.mrb[4].mxu0 %vm268_vm0, %v253_v11 }
  0x90   : > { %1150 = vmatprep.mubr.msk.f32.mxu0 %vm268_vm0, %v254_v12 }
  0x93   : > { %1151 = vmatmul.mubr.msk.f32.gmra.mrb[6].mxu0 %vm268_vm0, %v255_v13 }
 0x15a   : > { %v1143_v15 = vpop.f32.mrb[0].mxu0 }
 0x15b   : > { %v359_v16 = vpop.f32.mrb[1].mxu0 }
 0x15c   : > { %v1189_v17 = vpack.c.bf16 %v1143_v15, %v359_v16 }
 0x15e   : > { %v1146_v18 = vpop.f32.mrb[2].mxu0  ;;  %1190 = vmatprep.subr.bf16.mxu1 %v1189_v17 }
 0x15f   : > { %v369_v19 = vpop.f32.mrb[3].mxu0  ;;  %1192 = vmatpush3.bf16.msra.mxu1 %v1189_v17 }
 0x160   : > { %v1193_v21 = vpack.c.bf16 %v1146_v18, %v369_v19 }
 0x162   : > { %v1149_v23 = vpop.f32.mrb[4].mxu0  ;;  %1158 = vmatmul.mubr.msk.f32.vlgmr.msra.gmra.mrb[0].mxu1 %vm398_vm1, %v257_v20  ;;  %1194 = vmatprep.subr.bf16.mxu1 %v1193_v21 }
 0x163   : > { %v379_v24 = vpop.f32.mrb[5].mxu0  ;;  %1196 = vmatpush3.bf16.msra.mxu1 %v1193_v21  ;;  %1164 = vmatprep.mubr.msk.f32.mxu1 %vm398_vm1, %v258_v22 }
 0x164   : > { %v1197_v26 = vpack.c.bf16 %v1149_v23, %v379_v24 }
 0x166   : > { %v1152_v28 = vpop.f32.mrb[6].mxu0  ;;  %1165 = vmatmul.mubr.msk.f32.vlgmr.msra.gmra.mrb[2].mxu1 %vm398_vm1, %v259_v25  ;;  %1198 = vmatprep.subr.bf16.mxu1 %v1197_v26 }
 0x167   : > { %v389_v29 = vpop.f32.mrb[7].mxu0  ;;  %1200 = vmatpush3.bf16.msra.mxu1 %v1197_v26  ;;  %1171 = vmatprep.mubr.msk.f32.mxu1 %vm398_vm1, %v260_v27 }
 0x168   : > { %v1201_v31 = vpack.c.bf16 %v1152_v28, %v389_v29 }
 0x16a   : > { %1172 = vmatmul.mubr.msk.f32.vlgmr.msra.gmra.mrb[4].mxu1 %vm398_vm1, %v261_v30  ;;  %1202 = vmatprep.subr.bf16.mxu1 %v1201_v31 }
 0x16b   : > { %1204 = vmatpush3.bf16.msra.mxu1 %v1201_v31  ;;  %1178 = vmatprep.mubr.msk.f32.mxu1 %vm398_vm1, %v262_v32 }
 0x16e   : > { %1179 = vmatmul.mubr.msk.f32.vlgmr.msra.gmra.mrb[6].mxu1 %vm398_vm1, %v263_v33 }
 0x235   : > { %v1746_v34 = vpop.f32.mrb[0].mxu1 }
 0x236   : > { %v724_v35 = vmax.f32 %v1746_v34, 0.0  ;;  %v1749_v36 = vpop.f32.mrb[1].mxu1 }
 0x237   : > { %v723_v37 = vmax.f32 %v1749_v36, 0.0 }
 0x238   : > { %v732_v38 = vsel %vm268_vm0, %v724_v35, 0.0 }
 0x239   : > { %v731_v39 = vsel %vm268_vm0, %v723_v37, 0.0  ;;  %v1756_v40 = vpop.f32.mrb[2].mxu1 }
 0x23a   : > { %v733_v41 = vadd.f32 %v732_v38, %v731_v39  ;;  %v726_v42 = vmax.f32 %v1756_v40, 0.0  ;;  %v552_v43 = vpop.f32.mrb[3].mxu1 }
 0x23b   : > { %v725_v44 = vmax.f32 %v552_v43, 0.0 }
 0x23c   : > { %v734_v45 = vrot.slane %v733_v41, 4  ;;  %v741_v46 = vsel %vm268_vm0, %v726_v42, 0.0 }
 0x23d   : > { %v740_v47 = vsel %vm268_vm0, %v725_v44, 0.0  ;;  %v1763_v48 = vpop.f32.mrb[4].mxu1 }
 0x23e   : > { %v735_v49 = vadd.f32 %v734_v45, %v733_v41  ;;  %v742_v50 = vadd.f32 %v741_v46, %v740_v47  ;;  %v728_v51 = vmax.f32 %v1763_v48, 0.0  ;;  %v633_v52 = vpop.f32.mrb[5].mxu1 }
 0x23f   : > { %v727_v53 = vmax.f32 %v633_v52, 0.0 }
 0x240   : > { %v736_v54 = vrot.slane %v735_v49, 2  ;;  %v743_v55 = vrot.slane %v742_v50, 4  ;;  %v750_v56 = vsel %vm268_vm0, %v728_v51, 0.0 }
 0x241   : > { %v749_v57 = vsel %vm268_vm0, %v727_v53, 0.0  ;;  %v1770_v58 = vpop.f32.mrb[6].mxu1 }
 0x242   : > { %v737_v59 = vadd.f32 %v736_v54, %v735_v49  ;;  %v744_v60 = vadd.f32 %v743_v55, %v742_v50  ;;  %v751_v61 = vadd.f32 %v750_v56, %v749_v57  ;;  %v730_v62 = vmax.f32 %v1770_v58, 0.0  ;;  %v714_v63 = vpop.f32.mrb[7].mxu1 }
 0x243   : > { %v729_v0 = vmax.f32 %v714_v63, 0.0 }
 0x244   : > { %v738_v1 = vrot.slane %v737_v59, 1  ;;  %v745_v2 = vrot.slane %v744_v60, 2  ;;  %v752_v3 = vrot.slane %v751_v61, 4  ;;  %v759_v4 = vsel %vm268_vm0, %v730_v62, 0.0 }
 0x245   : > { %v758_v5 = vsel %vm268_vm0, %v729_v0, 0.0 }
 0x246   : > { %v739_v6 = vadd.f32 %v738_v1, %v737_v59  ;;  %v746_v7 = vadd.f32 %v745_v2, %v744_v60  ;;  %v753_v8 = vadd.f32 %v752_v3, %v751_v61  ;;  %v760_v9 = vadd.f32 %v759_v4, %v758_v5 }
 0x248   : > { %v768_v10 = vmul.f32 0.0625, %v739_v6  ;;  %v747_v11 = vrot.slane %v746_v7, 1  ;;  %v754_v12 = vrot.slane %v753_v8, 2  ;;  %v761_v13 = vrot.slane %v760_v9, 4 }
 0x24a   : > { %v772_v14 = vadd.f32 1e-06, %v768_v10  ;;  %v748_v15 = vadd.f32 %v747_v11, %v746_v7  ;;  %v755_v16 = vadd.f32 %v754_v12, %v753_v8  ;;  %v762_v17 = vadd.f32 %v761_v13, %v760_v9 }
 0x24c   : > { %1271 = vrcp.f32 %v772_v14  ;;  %v769_v18 = vmul.f32 0.0625, %v748_v15  ;;  %v756_v19 = vrot.slane %v755_v16, 1  ;;  %v763_v20 = vrot.slane %v762_v17, 2 }
 0x24e   : > { %v773_v21 = vadd.f32 1e-06, %v769_v18  ;;  %v757_v22 = vadd.f32 %v756_v19, %v755_v16  ;;  %v764_v23 = vadd.f32 %v763_v20, %v762_v17 }
 0x250   : > { %1273 = vrcp.f32 %v773_v21  ;;  %v770_v24 = vmul.f32 0.0625, %v757_v22  ;;  %v765_v25 = vrot.slane %v764_v23, 1 }
 0x252   : > { %v774_v26 = vadd.f32 1e-06, %v770_v24  ;;  %v766_v27 = vadd.f32 %v765_v25, %v764_v23 }
 0x254   : > { %1275 = vrcp.f32 %v774_v26  ;;  %v771_v28 = vmul.f32 0.0625, %v766_v27 }
 0x256   : > { %v1272_v29 = vpop.eup %1271  ;;  %v775_v30 = vadd.f32 1e-06, %v771_v28 }
 0x257   : > { %v1777_v31 = vmul.f32 %v1272_v29, %v723_v37  ;;  %v1781_v32 = vmul.f32 %v1272_v29, %v724_v35 }
 0x258   : > { %1277 = vrcp.f32 %v775_v30 }
 0x259   : > { %v812_v36 = vand.u32 2147483647, %v1777_v31  ;;  %v813_v38 = vand.u32 2147483647, %v1781_v32  ;;  %v788_v12 = vmax.f32 %v1777_v31, 0.0  ;;  %v789_v13 = vmax.f32 %v1781_v32, 0.0 }
 0x25a   : > { %v1274_v33 = vpop.eup %1273  ;;  %vm796_vm2 = vcmp.ne.f32.partialorder %v1777_v31, %v1777_v31  ;;  %vm797_vm3 = vcmp.ne.f32.partialorder %v1781_v32, %v1781_v32 }
 0x25b   : > { %v1785_v39 = vmul.f32 %v1274_v33, %v725_v44  ;;  %v1789_v41 = vmul.f32 %v1274_v33, %v726_v42  ;;  %v820_v43 = vsub.f32 0.0, %v812_v36  ;;  %v821_v45 = vsub.f32 0.0, %v813_v38 }
 0x25d   : > { %v828_v46 = vmul.f32 1.442695, %v820_v43  ;;  %v830_v47 = vmul.f32 1.442695, %v821_v45  ;;  %v814_v34 = vand.u32 2147483647, %v1785_v39  ;;  %vm798_vm5 = vcmp.ne.f32.partialorder %v1785_v39, %v1785_v39 }
 0x25e   : > { %v1276_v37 = vpop.eup %1275  ;;  %v815_v35 = vand.u32 2147483647, %v1789_v41  ;;  %v790_v22 = vmax.f32 %v1785_v39, 0.0  ;;  %v791_v23 = vmax.f32 %v1789_v41, 0.0  ;;  %vm799_vm6 = vcmp.ne.f32.partialorder %v1789_v41, %v1789_v41 }
 0x25f   : > { %v1793_v49 = vmul.f32 %v1276_v37, %v727_v53  ;;  %v1797_v50 = vmul.f32 %v1276_v37, %v728_v51  ;;  %1279 = vpow2.f32 %v828_v46  ;;  %v822_v44 = vsub.f32 0.0, %v814_v34 }
 0x260   : > { %1281 = vpow2.f32 %v830_v47  ;;  %v823_v40 = vsub.f32 0.0, %v815_v35 }
 0x261   : > { %v832_v52 = vmul.f32 1.442695, %v822_v44  ;;  %v816_v54 = vand.u32 2147483647, %v1793_v49  ;;  %v817_v56 = vand.u32 2147483647, %v1797_v50  ;;  %vm800_vm12 = vcmp.ne.f32.partialorder %v1793_v49, %v1793_v49 }
 0x262   : > { %v1278_v42 = vpop.eup %1277  ;;  %v834_v55 = vmul.f32 1.442695, %v823_v40  ;;  %v792_v28 = vmax.f32 %v1793_v49, 0.0  ;;  %vm801_vm13 = vcmp.ne.f32.partialorder %v1797_v50, %v1797_v50 }
 0x263   : > { %v1801_v57 = vmul.f32 %v1278_v42, %v729_v0  ;;  %v1805_v53 = vmul.f32 %v1278_v42, %v730_v62  ;;  %1283 = vpow2.f32 %v832_v52  ;;  %v824_v48 = vsub.f32 0.0, %v816_v54 }
 0x264   : > { %1285 = vpow2.f32 %v834_v55  ;;  %v825_v51 = vsub.f32 0.0, %v817_v56 }
 0x265   : > { %v836_v59 = vmul.f32 1.442695, %v824_v48  ;;  %v818_v60 = vand.u32 2147483647, %v1801_v57  ;;  %v819_v4 = vand.u32 2147483647, %v1805_v53  ;;  %vm802_vm15 = vcmp.ne.f32.partialorder %v1801_v57, %v1801_v57 }
 0x266   : > { %v838_v61 = vmul.f32 1.442695, %v825_v51 }
 0x267   : > { %1287 = vpow2.f32 %v836_v59  ;;  %v826_v63 = vsub.f32 0.0, %v818_v60  ;;  %v827_v7 = vsub.f32 0.0, %v819_v4 }
 0x268   : > { %1289 = vpow2.f32 %v838_v61 }
 0x269   : > { %v1280_v1 = vpop.eup %1279  ;;  %v840_v2 = vmul.f32 1.442695, %v826_v63  ;;  %v842_v18 = vmul.f32 1.442695, %v827_v7 }
 0x26a   : > { %v1282_v3 = vpop.eup %1281  ;;  %v844_v0 = vadd.f32 1.0, %v1280_v1  ;;  %v847_v8 = vmul.f32 -0.5, %v1280_v1  ;;  %v850_v15 = vand.u32 2147483647, %v1280_v1 }
 0x26b   : > { %v853_v58 = vadd.f32 1.0, %v1282_v3  ;;  %1291 = vpow2.f32 %v840_v2  ;;  %v856_v9 = vmul.f32 -0.5, %v1282_v3  ;;  %v859_v26 = vand.u32 2147483647, %v1282_v3 }
 0x26c   : > { %1293 = vlog2.f32 %v844_v0  ;;  %v848_v19 = vadd.f32 1.0, %v847_v8  ;;  %vm1830_vm4 = vcmp.lt.f32.partialorder %v850_v15, 0.0004427343 }
 0x26d   : > { %v1284_v62 = vpop.eup %1283  ;;  %1295 = vlog2.f32 %v853_v58  ;;  %v857_v20 = vadd.f32 1.0, %v856_v9  ;;  %vm860_vm7 = vcmp.lt.f32.partialorder %v859_v26, 0.0004427343 }
 0x26e   : > { %v1809_v5 = vpop.eup %1285  ;;  %v862_v6 = vadd.f32 1.0, %v1284_v62  ;;  %v865_v16 = vmul.f32 -0.5, %v1284_v62  ;;  %v868_v27 = vand.u32 2147483647, %v1284_v62  ;;  %v849_v45 = vmul.f32 %v1280_v1, %v848_v19 }
 0x26f   : > { %v871_v10 = vadd.f32 1.0, %v1809_v5  ;;  %v874_v24 = vmul.f32 -0.5, %v1809_v5  ;;  %v858_v37 = vmul.f32 %v1282_v3, %v857_v20  ;;  %v877_v42 = vand.u32 2147483647, %v1809_v5 }
 0x270   : > { %1297 = vlog2.f32 %v862_v6  ;;  %v866_v33 = vadd.f32 1.0, %v865_v16  ;;  %vm1843_vm8 = vcmp.lt.f32.partialorder %v868_v27, 0.0004427343  ;;  %v794_v27 = vmax.f32 %v1801_v57, 0.0 }
 0x271   : > { %v1812_v11 = vpop.eup %1287  ;;  %1299 = vlog2.f32 %v871_v10  ;;  %v875_v34 = vadd.f32 1.0, %v874_v24  ;;  %vm878_vm9 = vcmp.lt.f32.partialorder %v877_v42, 0.0004427343 }
 0x272   : > { %v1816_v14 = vpop.eup %1289  ;;  %v880_v17 = vadd.f32 1.0, %v1812_v11  ;;  %v883_v46 = vmul.f32 -0.5, %v1812_v11  ;;  %v867_v56 = vmul.f32 %v1284_v62, %v866_v33  ;;  %v886_v48 = vand.u32 2147483647, %v1812_v11 }
 0x273   : > { %v889_v21 = vadd.f32 1.0, %v1816_v14  ;;  %v892_v35 = vmul.f32 -0.5, %v1816_v14  ;;  %v876_v3 = vmul.f32 %v1809_v5, %v875_v34 }
 0x274   : > { %1301 = vlog2.f32 %v880_v17  ;;  %v884_v61 = vadd.f32 1.0, %v883_v46  ;;  %vm1870_vm10 = vcmp.lt.f32.partialorder %v886_v48, 0.0004427343 }
 0x275   : > { %v1827_v25 = vpop.eup %1291  ;;  %1303 = vlog2.f32 %v889_v21  ;;  %v893_v0 = vadd.f32 1.0, %v892_v35 }
 0x276   : > { %v1294_v29 = vpop.eup %1293  ;;  %1305 = vpow2.f32 %v842_v18  ;;  %v898_v36 = vadd.f32 1.0, %v1827_v25  ;;  %v901_v63 = vmul.f32 -0.5, %v1827_v25  ;;  %v904_v19 = vand.u32 2147483647, %v1827_v25 }
 0x277   : > { %v1296_v38 = vpop.eup %1295  ;;  %v846_v43 = vmul.f32 0.6931472, %v1294_v29  ;;  %v894_v18 = vmul.f32 %v1816_v14, %v893_v0 }
 0x278   : > { %v855_v47 = vmul.f32 0.6931472, %v1296_v38  ;;  %1307 = vlog2.f32 %v898_v36  ;;  %vm905_vm14 = vcmp.lt.f32.partialorder %v904_v19, 0.0004427343 }
 0x279   : > { %v852_v44 = vsel %vm1830_vm4, %v849_v45, %v846_v43  ;;  %v795_v45 = vmax.f32 %v1805_v53, 0.0 }
 0x27a   : > { %v1298_v52 = vpop.eup %1297  ;;  %v861_v54 = vsel %vm860_vm7, %v858_v37, %v855_v47  ;;  %v916_v55 = vadd.f32 %v852_v44, %v788_v12  ;;  %v885_v12 = vmul.f32 %v1812_v11, %v884_v61 }
 0x27b   : > { %v1300_v51 = vpop.eup %1299  ;;  %v917_v59 = vadd.f32 %v861_v54, %v789_v13  ;;  %v864_v60 = vmul.f32 0.6931472, %v1298_v52  ;;  %v902_v13 = vadd.f32 1.0, %v901_v63 }
 0x27c   : > { %v924_v1 = vsel %vm796_vm2, %v1777_v31, %v916_v55  ;;  %v873_v2 = vmul.f32 0.6931472, %v1300_v51  ;;  %v895_v31 = vand.u32 2147483647, %v1816_v14  ;;  %vm803_vm2 = vcmp.ne.f32.partialorder %v1805_v53, %v1805_v53 }
 0x27d   : > { %v925_v4 = vsel %vm797_vm3, %v1781_v32, %v917_v59  ;;  %932 = vst.msk [vmem:[%s1860_s18] sm:$0xff] %vm268_vm0, %v924_v1  ;;  %v870_v58 = vsel %vm1843_vm8, %v867_v56, %v864_v60  ;;  %v793_v32 = vmax.f32 %v1797_v50, 0.0  ;;  %v903_v24 = vmul.f32 %v1827_v25, %v902_v13 }
 0x27e   : > { %v1302_v62 = vpop.eup %1301  ;;  %933 = vst.msk [vmem:[%s1860_s18 + $0x8] sm:$0xff] %vm268_vm0, %v925_v4  ;;  %v879_v5 = vsel %vm878_vm9, %v876_v3, %v873_v2  ;;  %v918_v6 = vadd.f32 %v870_v58, %v790_v22  ;;  %vm896_vm11 = vcmp.lt.f32.partialorder %v895_v31, 0.0004427343 }
 0x27f   : > { %v1304_v8 = vpop.eup %1303  ;;  %v919_v9 = vadd.f32 %v879_v5, %v791_v23  ;;  %v882_v10 = vmul.f32 0.6931472, %v1302_v62 }
 0x280   : > { %v1306_v15 = vpop.eup %1305  ;;  %v926_v16 = vsel %vm798_vm5, %v1785_v39, %v918_v6  ;;  %v891_v17 = vmul.f32 0.6931472, %v1304_v8 }
 0x281   : > { %v927_v20 = vsel %vm799_vm6, %v1789_v41, %v919_v9  ;;  %934 = vst.msk [vmem:[%s1860_s18 + $0x10] sm:$0xff] %vm268_vm0, %v926_v16  ;;  %v888_v11 = vsel %vm1870_vm10, %v885_v12, %v882_v10  ;;  %v907_v21 = vadd.f32 1.0, %v1306_v15  ;;  %v910_v30 = vmul.f32 -0.5, %v1306_v15 }
 0x282   : > { %v1308_v22 = vpop.eup %1307  ;;  %935 = vst.msk [vmem:[%s1860_s18 + $0x18] sm:$0xff] %vm268_vm0, %v927_v20  ;;  %v897_v39 = vsel %vm896_vm11, %v894_v18, %v891_v17  ;;  %v920_v14 = vadd.f32 %v888_v11, %v792_v28  ;;  %v913_v36 = vand.u32 2147483647, %v1306_v15 }
 0x283   : > { %v921_v41 = vadd.f32 %v897_v39, %v793_v32  ;;  %v900_v23 = vmul.f32 0.6931472, %v1308_v22  ;;  %1309 = vlog2.f32 %v907_v21 }
 0x284   : > { %v928_v26 = vsel %vm800_vm12, %v1793_v49, %v920_v14  ;;  %v911_v49 = vadd.f32 1.0, %v910_v30  ;;  %vm914_vm1 = vcmp.lt.f32.partialorder %v913_v36, 0.0004427343 }
 0x285   : > { %v929_v29 = vsel %vm801_vm13, %v1797_v50, %v921_v41  ;;  %936 = vst.msk [vmem:[%s1860_s18 + $0x20] sm:$0xff] %vm268_vm0, %v928_v26  ;;  %v906_v28 = vsel %vm905_vm14, %v903_v24, %v900_v23 }
 0x286   : > { %937 = vst.msk [vmem:[%s1860_s18 + $0x28] sm:$0xff] %vm268_vm0, %v929_v29  ;;  %v922_v25 = vadd.f32 %v906_v28, %v794_v27  ;;  %v912_v43 = vmul.f32 %v1306_v15, %v911_v49 }
 0x288   : > { %v930_v33 = vsel %vm802_vm15, %v1801_v57, %v922_v25 }
 0x289   : > { %938 = vst.msk [vmem:[%s1860_s18 + $0x30] sm:$0xff] %vm268_vm0, %v930_v33 }
 0x28d   : > { %v1310_v38 = vpop.eup %1309 }
 0x28e   : > { %v909_v50 = vmul.f32 0.6931472, %v1310_v38 }
 0x290   : > { %v915_v37 = vsel %vm914_vm1, %v912_v43, %v909_v50 }
 0x291   : > { %v923_v46 = vadd.f32 %v915_v37, %v795_v45 }
 0x293   : > { %v931_v57 = vsel %vm803_vm2, %v1805_v53, %v923_v46 }
 0x294   : > { %939 = vst.msk [vmem:[%s1860_s18 + $0x38] sm:$0xff] %vm268_vm0, %v931_v57 }
 0x295   : > { %1412 = shalt.err (!%p1409_p6)
}
 0x296   : > { %s1413_s22 = scalar_lea.hbm %s1916_s23, 1024  ;;  %s1417_s10 = scalar_lea.hbm %s1970_s3, 2048 }
 0x297   : > { %p1414_p8 = scmp.ne.s32.totalorder %s1916_s23, %s1413_s22  ;;  %p1418_p4 = scmp.lt.u32.totalorder %s1916_s23, %s1970_s3 }
 0x298   : > { %p1419_p11 = scmp.lt.u32.totalorder %s1417_s10, %s1413_s22  ;;  %p1421_p3 = scmp.lt.u32.totalorder %s1413_s22, %s1916_s23 }
 0x299   : > { %p1415_p10 = pnand %p1414_p8, %p1597_p12 }
 0x29a   : > { %p1420_p13 = por %p1419_p11, %p1418_p4 }
 0x29b   : > { %p1416_p0 = pneg %p1415_p10 }
 0x29c   : > { %p1422_p7 = por %p1421_p3, %p1420_p13 }
 0x29e   : > { %p1423_p9 = pnand %p1422_p7, %p1416_p0 }
 0x2a0   : > { %1426 = shalt.err (!%p1423_p9)
}
 0x2a1   : > { %s1481_s20 = smov 128   ;;  %s1482_s7 = smov 8  }
 0x2a2   : > { %1213 = dma.vmem_to_hbm [thread:$0]  (%p1597_p12), %s1918_s29, 1024, %s1916_s23, %s941_s16, %s1481_s20, %s1481_s20, %s1482_s7  }
 0x2a3 PF: > { %s970_s9 = sand.u32 1, %s1461_s12   ;;  %p2001_p1 = scmp.ne.s32.totalorder %s1981_s19, 0 }
 0x2a4   : > { %p2002_p5 = scmp.ge.s32.totalorder %s1473_s15, 2  ;;  %s971_s18 = scalar_lea.sflag [#allocation4], %s970_s9 }
 0x2a6   : > { %p1227_p2 = pnand %p2002_p5, %p2001_p1 }
 0x2a8   : > { %1456 = dma.done.wait (!%p1227_p2), %s971_s18, 1024  }
 0x2a9   : > { %1458 = vsyncadd (!%p1227_p2), %s971_s18, 4294966272  ;;  %p19_p6 = scmp.ge.s32.totalorder %s1559_s24, 4   ;;  %s2003_s12 = smov %s1465_s13 }
 0x2aa   : > { %s2004_s13 = smov %s1469_s14  ;;  %s2005_s14 = smov %s1593_s17 }
 0x2ab   : > { %s2006_s15 = smov %s1559_s24  ;;  %21 = sbr.rel (!%p19_p6) target bundleno = 10 (0xa), region = 94 }
 0x2b2   :  { %976 = vsyncpa [#allocation3], 1 }
 0x2b3   :  { %978 = vsyncpa [#allocation3 + $0x1], 1 }
 0x2b4   :  { %979 = vsyncpa [#allocation6], 1 }
 0x2b5   :  { %981 = vsyncpa [#allocation6 + $0x1], 1 }
 0x2b6   :  { %982 = vsyncpa [#allocation4], 1 }
 0x2b7   :  { %984 = vsyncpa [#allocation4 + $0x1], 1 }

</bundles_post_ra>
